<compile_context>
chip_gen: v7x
topology: tpu7x:2x2x1
jax: 0.10.0
libtpu: 0.0.40
codegen_flags: <defaults>
</compile_context>

<pallas_src>
import math

import jax
import jax.numpy as jnp
from jax import lax
from jax.experimental import pallas as pl
from jax.experimental.pallas import tpu as pltpu

BN_EPS = 1e-5
_INV_SQRT2 = 0.7071067811865476

# Abramowitz & Stegun 7.1.26 erf approximation (|err| <= 1.5e-7).
_ERF_P = 0.3275911
_ERF_A1 = 0.254829592
_ERF_A2 = -0.284496736
_ERF_A3 = 1.421413741
_ERF_A4 = -1.453152027
_ERF_A5 = 1.061405429


def _erf_approx(z):
    za = jnp.abs(z)
    t = 1.0 / (1.0 + _ERF_P * za)
    poly = t * (_ERF_A1 + t * (_ERF_A2 + t * (_ERF_A3 + t * (_ERF_A4 + t * _ERF_A5))))
    e = 1.0 - poly * jnp.exp(-za * za)
    return jnp.where(z < 0.0, -e, e)


def _gelu_exact(x):
    # nn.GELU() default = exact erf formulation (approximated to ~1e-7 above).
    return 0.5 * x * (1.0 + _erf_approx(x * _INV_SQRT2))


def _resblock_bn_kernel(x_ref, w0_ref, w1_ref, bias_ref, out_ref):
    """One batch-block per grid step, native NCL layout.

    x_ref/out_ref : (B_blk, C, L)   channels on sublanes, L on lanes (lane-dense)
    w0_ref        : (H, K0*C)       conv0 weight, BN0 folded, taps flattened
    w1_ref        : (H, K1*H)       conv1 weight, BN1 folded, taps flattened
    bias_ref      : (H, 2)          col 0 = folded bias0, col 1 = folded bias1
    """
    b_blk, C, L = x_ref.shape
    H = w0_ref.shape[0]
    K0 = w0_ref.shape[1] // C
    K1 = w1_ref.shape[1] // H
    BL = b_blk * L
    mm_dtype = w0_ref.dtype

    # Concatenate the batch block along the lane axis -> one lane-dense (C, BL) slab
    # so each conv is a single big MXU matmul (amortizes per-step overhead).
    if b_blk == 1:
        x = x_ref[0]
    else:
        x = jnp.concatenate([x_ref[b] for b in range(b_blk)], axis=-1)

    # Position within each length-L segment; batch boundaries sit at 0 / L-1.
    # C == H (required by the residual), so one mask tensor serves both convs.
    pos = lax.broadcasted_iota(jnp.int32, (C, BL), 1) % L

    def conv_bias_gelu(a, w_ref, bias_col, k):
        # Conv1d(k, stride=1, pad=k//2) as ONE matmul: the k taps are lane-rolled
        # copies (XLU; no padded scratch, no realignment copies), with lanes that
        # wrapped across a batch boundary masked to zero (= zero padding), then
        # concatenated along sublanes so the contraction dim is k*Cin.
        p = k // 2
        taps = []
        for t in range(k):
            s = p - t                                  # output[l] reads input[l - s]
            if s == 0:
                taps.append(a)
            else:
                rolled = pltpu.roll(a, shift=s % BL, axis=1)
                keep = (pos >= s) if s > 0 else (pos < L + s)
                taps.append(jnp.where(keep, rolled, 0.0))
        a_cat = taps[0] if k == 1 else jnp.concatenate(taps, axis=0)   # (k*Cin, BL)
        y = jnp.dot(w_ref[...], a_cat.astype(mm_dtype),
                    preferred_element_type=jnp.float32)
        return _gelu_exact(y + bias_col)               # bias_col (H,1) broadcasts over lanes

    h = conv_bias_gelu(x, w0_ref, bias_ref[:, 0:1], K0)    # (H, BL)
    y = conv_bias_gelu(h, w1_ref, bias_ref[:, 1:2], K1)    # (H, BL)

    # Residual: re-read the VMEM-resident input block per batch row instead of
    # keeping the concatenated x live across both convs (lower vreg pressure).
    for b in range(b_blk):
        out_ref[b] = (x_ref[b] + y[:, b * L:(b + 1) * L]).astype(out_ref.dtype)


def _fold_bn_into_conv(w_oik, b, gamma, beta, mean, var, *, eps=BN_EPS,
                       dtype=jnp.float32):
    """Fold eval-mode BatchNorm1d into the preceding Conv1d and flatten the taps.

    w_oik: (O, I, K) PyTorch Conv1d weight.  Returns (w_cat (O, K*I), bias (O,)).
    """
    scale = gamma * lax.rsqrt(var + eps)                      # (O,)
    w = w_oik * scale[:, None, None]
    O, I, K = w.shape
    w_cat = jnp.transpose(w, (0, 2, 1)).reshape(O, K * I)     # [o, k*I + i] = w[o, i, k]
    b_fold = (b - mean) * scale + beta
    return w_cat.astype(dtype), b_fold.astype(jnp.float32)


def resblock_bn_forward(x_ncl, params):
    """x_ncl: (B, C, L) float32 in PyTorch NCL layout.  Returns (B, C, L)."""
    B, C, L = x_ncl.shape
    H, C0, K0 = params["w0"].shape
    H1, C1, K1 = params["w1"].shape
    assert C0 == C and C1 == H and H1 == H
    assert C == H, "residual add requires in_features == encoder_h"
    assert K0 % 2 == 1 and K1 % 2 == 1 and K0 // 2 < L and K1 // 2 < L

    # bf16 weights/activations (f32 MXU accumulation) only once the matmuls are big
    # enough to be MXU-bound; small encoder_h stays f32 (memory-bound anyway, and
    # tracks the f32 PyTorch reference more tightly).
    mm_dtype = jnp.bfloat16 if H >= 128 else jnp.float32

    w0c, b0 = _fold_bn_into_conv(params["w0"], params["b0"], params["bn0_gamma"],
                                 params["bn0_beta"], params["bn0_mean"],
                                 params["bn0_var"], dtype=mm_dtype)
    w1c, b1 = _fold_bn_into_conv(params["w1"], params["b1"], params["bn1_gamma"],
                                 params["bn1_beta"], params["bn1_mean"],
                                 params["bn1_var"], dtype=mm_dtype)
    bias = jnp.stack([b0, b1], axis=1)                        # (H, 2)

    # Batch blocking: several batch rows share a grid step (lane-concatenated in the
    # kernel) so the matmul N dim is a few hundred lanes and per-step overhead is
    # amortized.  b_blk is reduced to a divisor of B.
    b_blk = max(1, min(B, max(1, 512 // L)))
    while B % b_blk:
        b_blk -= 1
    grid = (B // b_blk,)

    # Derive the VMEM limit from the actual working set instead of hard-coding 32 MiB.
    wbytes = jnp.dtype(mm_dtype).itemsize
    blk_bytes = b_blk * C * L * 4
    need = (2 * 2 * blk_bytes                                           # in+out, double-buffered
            + 2 * ((H * K0 * C + H * K1 * H) * wbytes + H * 2 * 4)      # weights + bias
            + 2 * (K0 * C + K1 * H + 2 * H) * b_blk * L * 4             # in-kernel temporaries
            + (1 << 20))
    try:
        vmem_cap = int(pltpu.get_tpu_info().vmem_capacity_bytes)
    except Exception:
        vmem_cap = 128 * 1024 * 1024
    vmem_limit = int(min(max(2 * need, 8 * 1024 * 1024), int(vmem_cap * 0.75)))

    return pl.pallas_call(
        _resblock_bn_kernel,
        out_shape=jax.ShapeDtypeStruct((B, C, L), jnp.float32),
        grid_spec=pltpu.PrefetchScalarGridSpec(
            num_scalar_prefetch=0,
            grid=grid,
            in_specs=[
                pl.BlockSpec((b_blk, C, L), lambda i: (i, 0, 0)),   # x, native NCL
                pl.BlockSpec((H, K0 * C), lambda i: (0, 0)),        # folded conv0 weight
                pl.BlockSpec((H, K1 * H), lambda i: (0, 0)),        # folded conv1 weight
                pl.BlockSpec((H, 2), lambda i: (0, 0)),             # folded biases
            ],
            out_specs=pl.BlockSpec((b_blk, C, L), lambda i: (i, 0, 0)),
        ),
        compiler_params=pltpu.CompilerParams(
            dimension_semantics=("parallel",),
            vmem_limit_bytes=vmem_limit,
        ),
    )(x_ncl, w0c, w1c, bias)


# ----------------------------- pure-JAX reference -----------------------------

def _ref_conv1d_same(x, w, b):
    # x: (B, Cin, L); w: (Cout, Cin, K) PyTorch layout; stride 1, padding K//2.
    K = w.shape[2]
    P = K // 2
    L = x.shape[2]
    xp = jnp.pad(x, ((0, 0), (0, 0), (P, P)))
    taps = jnp.stack([xp[:, :, k:k + L] for k in range(K)], axis=-1)   # (B, Cin, L, K)
    y = jnp.einsum("oik,bilk->bol", w, taps, precision=lax.Precision.HIGHEST)
    return y + b[None, :, None]


def resblock_bn_reference(x, params):
    def block(z, w, b, g, bt, m, v):
        y = _ref_conv1d_same(z, w, b)
        scale = g / jnp.sqrt(v + BN_EPS)
        y = (y - m[None, :, None]) * scale[None, :, None] + bt[None, :, None]
        return 0.5 * y * (1.0 + lax.erf(y * _INV_SQRT2))
    h = block(x, params["w0"], params["b0"], params["bn0_gamma"], params["bn0_beta"],
              params["bn0_mean"], params["bn0_var"])
    h = block(h, params["w1"], params["b1"], params["bn1_gamma"], params["bn1_beta"],
              params["bn1_mean"], params["bn1_var"])
    return x + h


def init_params(key, in_features, encoder_h, k=3):
    ks = jax.random.split(key, 10)
    bound0 = 1.0 / math.sqrt(in_features * k)
    bound1 = 1.0 / math.sqrt(encoder_h * k)
    return {
        # PyTorch Conv1d weight layout: (out_channels, in_channels, kernel).
        "w0": jax.random.uniform(ks[0], (encoder_h, in_features, k),
                                 jnp.float32, -bound0, bound0),
        "b0": jax.random.uniform(ks[1], (encoder_h,), jnp.float32, -bound0, bound0),
        "bn0_gamma": 1.0 + 0.1 * jax.random.normal(ks[2], (encoder_h,), jnp.float32),
        "bn0_beta": 0.1 * jax.random.normal(ks[3], (encoder_h,), jnp.float32),
        "bn0_mean": 0.1 * jax.random.normal(ks[4], (encoder_h,), jnp.float32),
        "bn0_var": jax.random.uniform(ks[5], (encoder_h,), jnp.float32, 0.5, 1.5),
        "w1": jax.random.uniform(ks[6], (encoder_h, encoder_h, k),
                                 jnp.float32, -bound1, bound1),
        "b1": jax.random.uniform(ks[7], (encoder_h,), jnp.float32, -bound1, bound1),
        "bn1_gamma": 1.0 + 0.1 * jax.random.normal(ks[8], (encoder_h,), jnp.float32),
        "bn1_beta": 0.1 * jax.random.normal(ks[9], (encoder_h,), jnp.float32),
        "bn1_mean": 0.05 * jnp.ones((encoder_h,), jnp.float32),
        "bn1_var": 0.9 * jnp.ones((encoder_h,), jnp.float32),
    }
    # TODO(synk): ResBlock_0 is built in __init__ but unused by forward(); omitted.


if __name__ == "__main__":
    B, C, L = 2, 16, 128       # batch, channels (= in_features = encoder_h), length
    key = jax.random.PRNGKey(0)
    kx, kp = jax.random.split(key)
    x = jax.random.normal(kx, (B, C, L), jnp.float32)       # PyTorch NCL layout
    params = init_params(kp, in_features=C, encoder_h=C, k=3)

    y = jax.jit(resblock_bn_forward)(x, params)
    jax.block_until_ready(y)

    y_ref = resblock_bn_reference(x, params)
    err = float(jnp.max(jnp.abs(y - y_ref)))
    assert y.shape == (B, C, L)
    assert bool(jnp.all(jnp.isfinite(y)))
    assert err < 2e-2, f"max abs error vs reference: {err}"
    print("KERNEL_OK")
</pallas_src>

<mosaic_0001>
module attributes {stable_mosaic.version = 11 : i64} {
  func.func @_resblock_bn_kernel(%arg0: i32, %arg1: memref<2x16x128xf32, #tpu.memory_space<vmem>>, %arg2: memref<16x48xf32, #tpu.memory_space<vmem>>, %arg3: memref<16x48xf32, #tpu.memory_space<vmem>>, %arg4: memref<16x2xf32, #tpu.memory_space<vmem>>, %arg5: memref<2x16x128xf32, #tpu.memory_space<vmem>>) attributes {dimension_semantics = [#tpu.dimension_semantics<parallel>], iteration_bounds = array<i64: 1>, scalar_prefetch = 0 : i64, scratch_operands = 0 : i64, tpu.core_type = #tpu.core_type<tc>, window_params = [{transform_indices = @transform_0, window_bounds = array<i64: 2, 16, 128>}, {pipeline_mode = #tpu.pipeline_mode<synchronous>, transform_indices = @transform_1, window_bounds = array<i64: 16, 48>}, {pipeline_mode = #tpu.pipeline_mode<synchronous>, transform_indices = @transform_2, window_bounds = array<i64: 16, 48>}, {pipeline_mode = #tpu.pipeline_mode<synchronous>, transform_indices = @transform_3, window_bounds = array<i64: 16, 2>}, {transform_indices = @transform_4, window_bounds = array<i64: 2, 16, 128>}]} {
    %c0 = arith.constant 0 : index
    %c0_0 = arith.constant 0 : index
    %c0_1 = arith.constant 0 : index
    %0 = vector.load %arg1[%c0, %c0_0, %c0_1] : memref<2x16x128xf32, #tpu.memory_space<vmem>>, vector<1x16x128xf32>
    %1 = vector.shape_cast %0 : vector<1x16x128xf32> to vector<16x128xf32>
    %c1 = arith.constant 1 : index
    %c0_2 = arith.constant 0 : index
    %c0_3 = arith.constant 0 : index
    %2 = vector.load %arg1[%c1, %c0_2, %c0_3] : memref<2x16x128xf32, #tpu.memory_space<vmem>>, vector<1x16x128xf32>
    %3 = vector.shape_cast %2 : vector<1x16x128xf32> to vector<16x128xf32>
    %4 = tpu.concatenate %1, %3 in 1 : vector<16x128xf32>, vector<16x128xf32> -> vector<16x256xf32>
    %5 = tpu.iota {dimensions = array<i32: 1>} : vector<16x256xi32>
    %c128_i32 = arith.constant 128 : i32
    %c0_i32 = arith.constant 0 : i32
    %6 = arith.cmpi eq, %c128_i32, %c0_i32 : i32
    %c1_i32 = arith.constant 1 : i32
    %7 = arith.select %6, %c1_i32, %c128_i32 : i32
    %8 = vector.broadcast %7 : i32 to vector<16x256xi32>
    %9 = arith.remsi %5, %8 : vector<16x256xi32>
    %c0_i32_4 = arith.constant 0 : i32
    %10 = vector.broadcast %c0_i32_4 : i32 to vector<16x256xi32>
    %11 = arith.cmpi ne, %9, %10 : vector<16x256xi32>
    %c0_i32_5 = arith.constant 0 : i32
    %12 = vector.broadcast %c0_i32_5 : i32 to vector<16x256xi32>
    %13 = arith.cmpi slt, %9, %12 : vector<16x256xi32>
    %c0_i32_6 = arith.constant 0 : i32
    %14 = arith.cmpi slt, %7, %c0_i32_6 : i32
    %15 = vector.broadcast %14 : i1 to vector<16x256xi1>
    %16 = vector.broadcast %15 : vector<16x256xi1> to vector<16x256xi1>
    %17 = arith.xori %13, %16 : vector<16x256xi1>
    %18 = arith.andi %17, %11 : vector<16x256xi1>
    %19 = vector.broadcast %7 : i32 to vector<16x256xi32>
    %20 = arith.addi %9, %19 : vector<16x256xi32>
    %21 = arith.select %18, %20, %9 : vector<16x256xi1>, vector<16x256xi32>
    %c0_7 = arith.constant 0 : index
    %c0_8 = arith.constant 0 : index
    %22 = vector.load %arg4[%c0_7, %c0_8] : memref<16x2xf32, #tpu.memory_space<vmem>>, vector<16x1xf32>
    %c1_i32_9 = arith.constant 1 : i32
    %23 = tpu.dynamic_rotate %4 by %c1_i32_9 dim 1 : vector<16x256xf32>, i32 -> vector<16x256xf32>
    %c1_i32_10 = arith.constant 1 : i32
    %24 = vector.broadcast %c1_i32_10 : i32 to vector<16x256xi32>
    %25 = arith.cmpi sge, %21, %24 : vector<16x256xi32>
    %cst = arith.constant 0.000000e+00 : f32
    %26 = vector.broadcast %cst : f32 to vector<16x256xf32>
    %27 = arith.select %25, %23, %26 : vector<16x256xi1>, vector<16x256xf32>
    %c255_i32 = arith.constant 255 : i32
    %28 = tpu.dynamic_rotate %4 by %c255_i32 dim 1 : vector<16x256xf32>, i32 -> vector<16x256xf32>
    %c127_i32 = arith.constant 127 : i32
    %29 = vector.broadcast %c127_i32 : i32 to vector<16x256xi32>
    %30 = arith.cmpi slt, %21, %29 : vector<16x256xi32>
    %cst_11 = arith.constant 0.000000e+00 : f32
    %31 = vector.broadcast %cst_11 : f32 to vector<16x256xf32>
    %32 = arith.select %30, %28, %31 : vector<16x256xi1>, vector<16x256xf32>
    %33 = tpu.concatenate %27, %4, %32 in 0 : vector<16x256xf32>, vector<16x256xf32>, vector<16x256xf32> -> vector<48x256xf32>
    %c0_12 = arith.constant 0 : index
    %c0_13 = arith.constant 0 : index
    %34 = vector.load %arg2[%c0_12, %c0_13] : memref<16x48xf32, #tpu.memory_space<vmem>>, vector<16x48xf32>
    %cst_14 = arith.constant dense<0.000000e+00> : vector<16x256xf32>
    %35 = tpu.matmul %34, %33, %cst_14 {dimension_numbers = #tpu.dot_dimension_numbers<[1], [0], [0], [1], [0, 0, 1, 1], [], []>} : vector<16x48xf32>, vector<48x256xf32>, vector<16x256xf32> -> vector<16x256xf32>
    %36 = vector.broadcast %22 : vector<16x1xf32> to vector<16x256xf32>
    %37 = arith.addf %35, %36 : vector<16x256xf32>
    %cst_15 = arith.constant 5.000000e-01 : f32
    %38 = vector.broadcast %cst_15 : f32 to vector<16x256xf32>
    %39 = arith.mulf %38, %37 : vector<16x256xf32>
    %cst_16 = arith.constant 0.707106769 : f32
    %40 = vector.broadcast %cst_16 : f32 to vector<16x256xf32>
    %41 = arith.mulf %37, %40 : vector<16x256xf32>
    %42 = math.absf %41 : vector<16x256xf32>
    %cst_17 = arith.constant 0.327591091 : f32
    %43 = vector.broadcast %cst_17 : f32 to vector<16x256xf32>
    %44 = arith.mulf %43, %42 : vector<16x256xf32>
    %cst_18 = arith.constant 1.000000e+00 : f32
    %45 = vector.broadcast %cst_18 : f32 to vector<16x256xf32>
    %46 = arith.addf %45, %44 : vector<16x256xf32>
    %cst_19 = arith.constant 1.000000e+00 : f32
    %47 = vector.broadcast %cst_19 : f32 to vector<16x256xf32>
    %48 = arith.divf %47, %46 : vector<16x256xf32>
    %cst_20 = arith.constant 1.06140542 : f32
    %49 = vector.broadcast %cst_20 : f32 to vector<16x256xf32>
    %50 = arith.mulf %48, %49 : vector<16x256xf32>
    %cst_21 = arith.constant -1.45315206 : f32
    %51 = vector.broadcast %cst_21 : f32 to vector<16x256xf32>
    %52 = arith.addf %51, %50 : vector<16x256xf32>
    %53 = arith.mulf %48, %52 : vector<16x256xf32>
    %cst_22 = arith.constant 1.42141378 : f32
    %54 = vector.broadcast %cst_22 : f32 to vector<16x256xf32>
    %55 = arith.addf %54, %53 : vector<16x256xf32>
    %56 = arith.mulf %48, %55 : vector<16x256xf32>
    %cst_23 = arith.constant -0.284496725 : f32
    %57 = vector.broadcast %cst_23 : f32 to vector<16x256xf32>
    %58 = arith.addf %57, %56 : vector<16x256xf32>
    %59 = arith.mulf %48, %58 : vector<16x256xf32>
    %cst_24 = arith.constant 0.254829586 : f32
    %60 = vector.broadcast %cst_24 : f32 to vector<16x256xf32>
    %61 = arith.addf %60, %59 : vector<16x256xf32>
    %62 = arith.mulf %48, %61 : vector<16x256xf32>
    %cst_25 = arith.constant 0.000000e+00 : f32
    %63 = vector.broadcast %cst_25 : f32 to vector<16x256xf32>
    %64 = arith.subf %63, %42 : vector<16x256xf32>
    %65 = arith.mulf %64, %42 : vector<16x256xf32>
    %66 = math.exp %65 : vector<16x256xf32>
    %67 = arith.mulf %62, %66 : vector<16x256xf32>
    %cst_26 = arith.constant 1.000000e+00 : f32
    %68 = vector.broadcast %cst_26 : f32 to vector<16x256xf32>
    %69 = arith.subf %68, %67 : vector<16x256xf32>
    %cst_27 = arith.constant 0.000000e+00 : f32
    %70 = vector.broadcast %cst_27 : f32 to vector<16x256xf32>
    %71 = arith.cmpf olt, %41, %70 : vector<16x256xf32>
    %cst_28 = arith.constant 0.000000e+00 : f32
    %72 = vector.broadcast %cst_28 : f32 to vector<16x256xf32>
    %73 = arith.subf %72, %69 : vector<16x256xf32>
    %74 = arith.select %71, %73, %69 : vector<16x256xi1>, vector<16x256xf32>
    %cst_29 = arith.constant 1.000000e+00 : f32
    %75 = vector.broadcast %cst_29 : f32 to vector<16x256xf32>
    %76 = arith.addf %75, %74 : vector<16x256xf32>
    %77 = arith.mulf %39, %76 : vector<16x256xf32>
    %c0_30 = arith.constant 0 : index
    %c1_31 = arith.constant 1 : index
    %78 = vector.load %arg4[%c0_30, %c1_31] : memref<16x2xf32, #tpu.memory_space<vmem>>, vector<16x1xf32>
    %c1_i32_32 = arith.constant 1 : i32
    %79 = tpu.dynamic_rotate %77 by %c1_i32_32 dim 1 : vector<16x256xf32>, i32 -> vector<16x256xf32>
    %c1_i32_33 = arith.constant 1 : i32
    %80 = vector.broadcast %c1_i32_33 : i32 to vector<16x256xi32>
    %81 = arith.cmpi sge, %21, %80 : vector<16x256xi32>
    %cst_34 = arith.constant 0.000000e+00 : f32
    %82 = vector.broadcast %cst_34 : f32 to vector<16x256xf32>
    %83 = arith.select %81, %79, %82 : vector<16x256xi1>, vector<16x256xf32>
    %c255_i32_35 = arith.constant 255 : i32
    %84 = tpu.dynamic_rotate %77 by %c255_i32_35 dim 1 : vector<16x256xf32>, i32 -> vector<16x256xf32>
    %c127_i32_36 = arith.constant 127 : i32
    %85 = vector.broadcast %c127_i32_36 : i32 to vector<16x256xi32>
    %86 = arith.cmpi slt, %21, %85 : vector<16x256xi32>
    %cst_37 = arith.constant 0.000000e+00 : f32
    %87 = vector.broadcast %cst_37 : f32 to vector<16x256xf32>
    %88 = arith.select %86, %84, %87 : vector<16x256xi1>, vector<16x256xf32>
    %89 = tpu.concatenate %83, %77, %88 in 0 : vector<16x256xf32>, vector<16x256xf32>, vector<16x256xf32> -> vector<48x256xf32>
    %c0_38 = arith.constant 0 : index
    %c0_39 = arith.constant 0 : index
    %90 = vector.load %arg3[%c0_38, %c0_39] : memref<16x48xf32, #tpu.memory_space<vmem>>, vector<16x48xf32>
    %cst_40 = arith.constant dense<0.000000e+00> : vector<16x256xf32>
    %91 = tpu.matmul %90, %89, %cst_40 {dimension_numbers = #tpu.dot_dimension_numbers<[1], [0], [0], [1], [0, 0, 1, 1], [], []>} : vector<16x48xf32>, vector<48x256xf32>, vector<16x256xf32> -> vector<16x256xf32>
    %92 = vector.broadcast %78 : vector<16x1xf32> to vector<16x256xf32>
    %93 = arith.addf %91, %92 : vector<16x256xf32>
    %cst_41 = arith.constant 5.000000e-01 : f32
    %94 = vector.broadcast %cst_41 : f32 to vector<16x256xf32>
    %95 = arith.mulf %94, %93 : vector<16x256xf32>
    %cst_42 = arith.constant 0.707106769 : f32
    %96 = vector.broadcast %cst_42 : f32 to vector<16x256xf32>
    %97 = arith.mulf %93, %96 : vector<16x256xf32>
    %98 = math.absf %97 : vector<16x256xf32>
    %cst_43 = arith.constant 0.327591091 : f32
    %99 = vector.broadcast %cst_43 : f32 to vector<16x256xf32>
    %100 = arith.mulf %99, %98 : vector<16x256xf32>
    %cst_44 = arith.constant 1.000000e+00 : f32
    %101 = vector.broadcast %cst_44 : f32 to vector<16x256xf32>
    %102 = arith.addf %101, %100 : vector<16x256xf32>
    %cst_45 = arith.constant 1.000000e+00 : f32
    %103 = vector.broadcast %cst_45 : f32 to vector<16x256xf32>
    %104 = arith.divf %103, %102 : vector<16x256xf32>
    %cst_46 = arith.constant 1.06140542 : f32
    %105 = vector.broadcast %cst_46 : f32 to vector<16x256xf32>
    %106 = arith.mulf %104, %105 : vector<16x256xf32>
    %cst_47 = arith.constant -1.45315206 : f32
    %107 = vector.broadcast %cst_47 : f32 to vector<16x256xf32>
    %108 = arith.addf %107, %106 : vector<16x256xf32>
    %109 = arith.mulf %104, %108 : vector<16x256xf32>
    %cst_48 = arith.constant 1.42141378 : f32
    %110 = vector.broadcast %cst_48 : f32 to vector<16x256xf32>
    %111 = arith.addf %110, %109 : vector<16x256xf32>
    %112 = arith.mulf %104, %111 : vector<16x256xf32>
    %cst_49 = arith.constant -0.284496725 : f32
    %113 = vector.broadcast %cst_49 : f32 to vector<16x256xf32>
    %114 = arith.addf %113, %112 : vector<16x256xf32>
    %115 = arith.mulf %104, %114 : vector<16x256xf32>
    %cst_50 = arith.constant 0.254829586 : f32
    %116 = vector.broadcast %cst_50 : f32 to vector<16x256xf32>
    %117 = arith.addf %116, %115 : vector<16x256xf32>
    %118 = arith.mulf %104, %117 : vector<16x256xf32>
    %cst_51 = arith.constant 0.000000e+00 : f32
    %119 = vector.broadcast %cst_51 : f32 to vector<16x256xf32>
    %120 = arith.subf %119, %98 : vector<16x256xf32>
    %121 = arith.mulf %120, %98 : vector<16x256xf32>
    %122 = math.exp %121 : vector<16x256xf32>
    %123 = arith.mulf %118, %122 : vector<16x256xf32>
    %cst_52 = arith.constant 1.000000e+00 : f32
    %124 = vector.broadcast %cst_52 : f32 to vector<16x256xf32>
    %125 = arith.subf %124, %123 : vector<16x256xf32>
    %cst_53 = arith.constant 0.000000e+00 : f32
    %126 = vector.broadcast %cst_53 : f32 to vector<16x256xf32>
    %127 = arith.cmpf olt, %97, %126 : vector<16x256xf32>
    %cst_54 = arith.constant 0.000000e+00 : f32
    %128 = vector.broadcast %cst_54 : f32 to vector<16x256xf32>
    %129 = arith.subf %128, %125 : vector<16x256xf32>
    %130 = arith.select %127, %129, %125 : vector<16x256xi1>, vector<16x256xf32>
    %cst_55 = arith.constant 1.000000e+00 : f32
    %131 = vector.broadcast %cst_55 : f32 to vector<16x256xf32>
    %132 = arith.addf %131, %130 : vector<16x256xf32>
    %133 = arith.mulf %95, %132 : vector<16x256xf32>
    %c0_56 = arith.constant 0 : index
    %c0_57 = arith.constant 0 : index
    %c0_58 = arith.constant 0 : index
    %134 = vector.load %arg1[%c0_56, %c0_57, %c0_58] : memref<2x16x128xf32, #tpu.memory_space<vmem>>, vector<1x16x128xf32>
    %135 = vector.shape_cast %134 : vector<1x16x128xf32> to vector<16x128xf32>
    %136 = vector.extract_strided_slice %133 {offsets = [0, 0], sizes = [16, 128], strides = [1, 1]} : vector<16x256xf32> to vector<16x128xf32>
    %137 = arith.addf %135, %136 : vector<16x128xf32>
    %c0_59 = arith.constant 0 : index
    %c0_60 = arith.constant 0 : index
    %c0_61 = arith.constant 0 : index
    %138 = vector.load %arg5[%c0_59, %c0_60, %c0_61] : memref<2x16x128xf32, #tpu.memory_space<vmem>>, vector<1x16x128xf32>
    %139 = vector.shape_cast %138 : vector<1x16x128xf32> to vector<16x128xf32>
    %140 = vector.shape_cast %137 : vector<16x128xf32> to vector<1x16x128xf32>
    tpu.vector_store %arg5[%c0_59, %c0_60, %c0_61], %140 {strides = array<i32>} : memref<2x16x128xf32, #tpu.memory_space<vmem>>, vector<1x16x128xf32>,
    %c1_62 = arith.constant 1 : index
    %c0_63 = arith.constant 0 : index
    %c0_64 = arith.constant 0 : index
    %141 = vector.load %arg1[%c1_62, %c0_63, %c0_64] : memref<2x16x128xf32, #tpu.memory_space<vmem>>, vector<1x16x128xf32>
    %142 = vector.shape_cast %141 : vector<1x16x128xf32> to vector<16x128xf32>
    %143 = vector.extract_strided_slice %133 {offsets = [0, 128], sizes = [16, 128], strides = [1, 1]} : vector<16x256xf32> to vector<16x128xf32>
    %144 = arith.addf %142, %143 : vector<16x128xf32>
    %c1_65 = arith.constant 1 : index
    %c0_66 = arith.constant 0 : index
    %c0_67 = arith.constant 0 : index
    %145 = vector.load %arg5[%c1_65, %c0_66, %c0_67] : memref<2x16x128xf32, #tpu.memory_space<vmem>>, vector<1x16x128xf32>
    %146 = vector.shape_cast %145 : vector<1x16x128xf32> to vector<16x128xf32>
    %147 = vector.shape_cast %144 : vector<16x128xf32> to vector<1x16x128xf32>
    tpu.vector_store %arg5[%c1_65, %c0_66, %c0_67], %147 {strides = array<i32>} : memref<2x16x128xf32, #tpu.memory_space<vmem>>, vector<1x16x128xf32>,
    return
  }
  func.func @transform_0(%arg0: i32) -> (i32, i32, i32) {
    %c0_i32 = arith.constant 0 : i32
    %c0_i32_0 = arith.constant 0 : i32
    %c0_i32_1 = arith.constant 0 : i32
    return %arg0, %c0_i32, %c0_i32_0 : i32, i32, i32
  }
  func.func @transform_1(%arg0: i32) -> (i32, i32) {
    %c0_i32 = arith.constant 0 : i32
    %c0_i32_0 = arith.constant 0 : i32
    %c0_i32_1 = arith.constant 0 : i32
    return %c0_i32, %c0_i32_0 : i32, i32
  }
  func.func @transform_2(%arg0: i32) -> (i32, i32) {
    %c0_i32 = arith.constant 0 : i32
    %c0_i32_0 = arith.constant 0 : i32
    %c0_i32_1 = arith.constant 0 : i32
    return %c0_i32, %c0_i32_0 : i32, i32
  }
  func.func @transform_3(%arg0: i32) -> (i32, i32) {
    %c0_i32 = arith.constant 0 : i32
    %c0_i32_0 = arith.constant 0 : i32
    %c0_i32_1 = arith.constant 0 : i32
    return %c0_i32, %c0_i32_0 : i32, i32
  }
  func.func @transform_4(%arg0: i32) -> (i32, i32, i32) {
    %c0_i32 = arith.constant 0 : i32
    %c0_i32_0 = arith.constant 0 : i32
    %c0_i32_1 = arith.constant 0 : i32
    return %arg0, %c0_i32, %c0_i32_0 : i32, i32, i32
  }
}

</mosaic_0001>

<bundles_post_ra>
// kernel: resblock_bn_forward.1
= control target key start
LH: loop header
LB: loop body
LE: loop exit
PB: predicated region body
PF: predicated region fallthrough
CT: control target
= control target key end

     0   :  { %s992_s0 = inlined_call_operand.vmem [shape: f32[2,16,128], index: 0, kind: input, shape index: {}]   ;;  %s993_s1 = inlined_call_operand.vmem [shape: f32[16,48], index: 1, kind: input, shape index: {}]   ;;  %s994_s2 = inlined_call_operand.vmem [shape: f32[16,48], index: 2, kind: input, shape index: {}]   ;;  %s995_s3 = inlined_call_operand.vmem [shape: f32[16,2], index: 3, kind: input, shape index: {}]   ;;  %s996_s4 = inlined_call_operand.hbm [shape: f32[2,16,128], index: 4, kind: output, shape index: {}]  }
   0x1   :  { %v754_v0 = vld [vmem:[%s992_s0] sm:$0xff]  ;;  %v759_v1 = vld [vmem:[%s992_s0 + $0x8] sm:$0xff]  ;;  %v764_v2 = vld [vmem:[%s992_s0 + $0x10] sm:$0xff] }
   0x2   :  { %v618_v3 = vpack.i.bf16 %v759_v1, %v754_v0  ;;  %v771_v4 = vld [vmem:[%s992_s0 + $0x18] sm:$0xff] }
   0x3   :  { %9 = vsyncpa [#allocation3], 0  ;;  %s718_s23 = smov 1   ;;  %s719_s24 = smov 127   ;;  %v623_v5 = vpack.i.bf16 %v771_v4, %v764_v2  ;;  %v720_v6 = vmov 0.0   ;;  %v784_v7 = vld [vmem:[%s995_s3] sm:$0xff]  ;;  %v23_v10 = vlaneseq  ;;  %v584_v25 = vpack.c.bf16 %v771_v4, %v764_v2 }
   0x4   :  { %619 = vrot.lane.b32.xlu0 %v618_v3, %s718_s23  ;;  %629 = vrot.lane.b32.xlu1 %v618_v3, %s719_s24  ;;  %v789_v8 = vld [vmem:[%s995_s3 + $0x8] sm:$0xff]  ;;  %v721_v9 = vmov 0   ;;  %v586_v38 = vpack.c.bf16 %v759_v1, %v754_v0  ;;  %v90_v44 = vld [vmem:[%s993_s1] sm:$0xff]  ;;  %vm102_vm9 = vcmask 392192  }
   0x5   :  { %173 = vmatprep.mubr.f32.mxu0 %v720_v6  ;;  %406 = vmatprep.mubr.f32.mxu1 %v720_v6  ;;  %v793_v11 = vand.u32 127, %v23_v10  ;;  %v91_v45 = vld [vmem:[%s993_s1 + $0x8] sm:$0xff]  ;;  %v326_v33 = vld [vmem:[%s994_s2] sm:$0xff] }
   0x6   :  { %638 = vset.pattern.permute.xlu0 %v721_v9  ;;  %639 = vset.pattern.permute.xlu1 %v721_v9 }
   0x7   :  { %v25_v12 = vadd.s32 128, %v793_v11  ;;  %vm60_vm0 = vcmp.lt.s32.totalorder %v793_v11, 1  ;;  %vm65_vm2 = vcmp.ge.s32.totalorder %v793_v11, 1  ;;  %vm79_vm4 = vcmp.lt.s32.totalorder %v793_v11, 127  ;;  %v327_v11 = vld [vmem:[%s994_s2 + $0x8] sm:$0xff]  ;;  %s723_s2 = smov [#allocation2]  }
   0x8   :  { %624 = vrot.lane.b32.xlu0 %v623_v5, %s718_s23  ;;  %634 = vrot.lane.b32.xlu1 %v623_v5, %s719_s24  ;;  %vm816_vm5 = vmpackc.low %vm65_vm2, %vm65_vm2  ;;  %s543_s8 = sshll.u32 %s723_s2, 4  ;;  %s544_s8 = int_to_ptr.vmem [resolvable:$true] %s543_s8 }
   0x9   :  { %v37_v15 = vand.u32 127, %v25_v12  ;;  %vm852_vm8 = vmpackc.low %vm79_vm4, %vm79_vm4  ;;  %s694_s9 = scalar_lea.vmem %s544_s8, 512  ;;  %p699_p1 = scmp.lt.s32.totalorder %s544_s8, %s544_s8 }
   0xa   :  { %p695_p0 = scmp.ne.s32.totalorder %s544_s8, %s694_s9  ;;  %p700_p2 = scmp.lt.s32.totalorder %s694_s9, %s694_s9 }
   0xb   :  { %vm797_vm1 = vcmp.ge.s32.totalorder %v37_v15, 1  ;;  %vm825_vm6 = vcmp.lt.s32.totalorder %v37_v15, 127 }
   0xc   :  { %94 = vperm.xlu0 %638, %v784_v7   ;;  %99 = vperm.xlu1 %639, %v789_v8   ;;  %vm579_vm3 = vmpackc.low %vm797_vm1, %vm797_vm1  ;;  %p701_p3 = por %p700_p2, %p699_p1 }
   0xd   :  { %vm589_vm7 = vmpackc.low %vm825_vm6, %vm825_vm6 }
   0xe   :  { %p702_p4 = pnand %p701_p3, %p695_p0 }
  0x76   :  { %v620_v13 = vpop.permute.xlu0 %619  ;;  %v630_v14 = vpop.permute.xlu1 %629 }
  0x77   :  { %v622_v21 = vunpack.i.h.bf16 %v620_v13  ;;  %v621_v22 = vunpack.i.l.bf16 %v620_v13  ;;  %v632_v23 = vunpack.i.h.bf16 %v630_v14  ;;  %v631_v24 = vunpack.i.l.bf16 %v630_v14 }
  0x7a   :  { %v625_v16 = vpop.permute.xlu0 %624  ;;  %v635_v19 = vpop.permute.xlu1 %634 }
  0x7b   :  { %v627_v17 = vunpack.i.h.bf16 %v625_v16  ;;  %v626_v18 = vunpack.i.l.bf16 %v625_v16  ;;  %v637_v26 = vunpack.i.h.bf16 %v635_v19  ;;  %v636_v27 = vunpack.i.l.bf16 %v635_v19 }
  0x7d   :  { %v61_v28 = vsel %vm60_vm0, %v621_v22, %v626_v18  ;;  %v62_v29 = vsel %vm60_vm0, %v622_v21, %v627_v17  ;;  %v63_v31 = vsel %vm60_vm0, %v626_v18, %v621_v22  ;;  %v64_v32 = vsel %vm60_vm0, %v627_v17, %v622_v21 }
  0x7e   :  { %v578_v30 = vpack.c.bf16 %v62_v29, %v61_v28  ;;  %v581_v34 = vpack.c.bf16 %v64_v32, %v63_v31  ;;  %v82_v36 = vsel %vm79_vm4, %v636_v27, %v631_v24  ;;  %v83_v37 = vsel %vm79_vm4, %v637_v26, %v632_v23 }
  0x7f   :  { %v80_v39 = vsel %vm79_vm4, %v631_v24, %v636_v27  ;;  %v81_v40 = vsel %vm79_vm4, %v632_v23, %v637_v26  ;;  %v588_v41 = vpack.c.bf16 %v83_v37, %v82_v36 }
  0x80   :  { %580 = vmatprep.subr.msk.bf16.mxu0 %vm579_vm3, %v578_v30  ;;  %v591_v43 = vpack.c.bf16 %v81_v40, %v80_v39 }
  0x81   :  { %583 = vmatpush1.bf16.msk.msra.mxu0 %vm816_vm5, %v581_v34 }
  0x82   :  { %585 = vmatprep.subr.bf16.mxu0 %v584_v25 }
  0x85   :  { %587 = vmatpush1.bf16.msra.mxu0 %v586_v38 }
  0x86   :  { %590 = vmatprep.subr.msk.bf16.mxu0 %vm589_vm7, %v588_v41 }
  0x89   :  { %593 = vmatpush1.bf16.msk.msra.mxu0 %vm852_vm8, %v591_v43 }
  0x8b   :  { %v95_v46 = vpop.permute.xlu0 %94  ;;  %v100_v51 = vpop.permute.xlu1 %99 }
  0x8c   :  { %564 = vmatmul.mubr.msk.f32.vlgmr.msra.gmra.mrb[0].mxu0 %vm102_vm9, %v90_v44 }
  0x8d   :  { %179 = vmatprep.mubr.f32.mxu0 %v720_v6 }
  0x90   :  { %565 = vmatmul.mubr.msk.f32.gmra.mrb[2].mxu0 %vm102_vm9, %v91_v45 }
 0x15f   :  { %v175_v47 = vpop.f32.mrb[0].mxu0 }
 0x160   :  { %v867_v48 = vadd.f32 %v175_v47, %v95_v46  ;;  %v177_v49 = vpop.f32.mrb[1].mxu0 }
 0x161   :  { %v869_v50 = vadd.f32 %v177_v49, %v95_v46 }
 0x162   :  { %v872_v52 = vmul.f32 0.70710677, %v867_v48 }
 0x163   :  { %v875_v53 = vmul.f32 0.70710677, %v869_v50  ;;  %v181_v54 = vpop.f32.mrb[2].mxu0 }
 0x164   :  { %v194_v55 = vand.u32 2147483647, %v872_v52  ;;  %v878_v56 = vadd.f32 %v181_v54, %v100_v51  ;;  %v183_v57 = vpop.f32.mrb[3].mxu0  ;;  %vm274_vm10 = vcmp.lt.f32.partialorder %v872_v52, 0.0 }
 0x165   :  { %v195_v58 = vand.u32 2147483647, %v875_v53  ;;  %v881_v59 = vadd.f32 %v183_v57, %v100_v51  ;;  %vm275_vm11 = vcmp.lt.f32.partialorder %v875_v53, 0.0  ;;  %v187_v53 = vmul.f32 0.5, %v869_v50 }
 0x166   :  { %v198_v60 = vmul.f32 0.3275911, %v194_v55  ;;  %v884_v61 = vmul.f32 0.70710677, %v878_v56  ;;  %v250_v16 = vsub.f32 0.0, %v194_v55  ;;  %v188_v52 = vmul.f32 0.5, %v878_v56 }
 0x167   :  { %v199_v62 = vmul.f32 0.3275911, %v195_v58  ;;  %v887_v63 = vmul.f32 0.70710677, %v881_v59  ;;  %v251_v17 = vsub.f32 0.0, %v195_v58 }
 0x168   :  { %v202_v3 = vadd.f32 1.0, %v198_v60  ;;  %v196_v5 = vand.u32 2147483647, %v884_v61  ;;  %v254_v19 = vmul.f32 %v250_v16, %v194_v55  ;;  %vm276_vm12 = vcmp.lt.f32.partialorder %v884_v61, 0.0 }
 0x169   :  { %v203_v9 = vadd.f32 1.0, %v199_v62  ;;  %v197_v10 = vand.u32 2147483647, %v887_v63  ;;  %v255_v24 = vmul.f32 %v251_v17, %v195_v58  ;;  %vm277_vm13 = vcmp.lt.f32.partialorder %v887_v63, 0.0 }
 0x16a   :  { %662 = vrcp.f32 %v202_v3  ;;  %v200_v12 = vmul.f32 0.3275911, %v196_v5  ;;  %v252_v21 = vsub.f32 0.0, %v196_v5  ;;  %v258_v29 = vmul.f32 1.442695, %v254_v19 }
 0x16b   :  { %664 = vrcp.f32 %v203_v9  ;;  %v201_v13 = vmul.f32 0.3275911, %v197_v10  ;;  %v253_v25 = vsub.f32 0.0, %v197_v10  ;;  %v260_v36 = vmul.f32 1.442695, %v255_v24 }
 0x16c   :  { %v204_v14 = vadd.f32 1.0, %v200_v12  ;;  %v256_v31 = vmul.f32 %v252_v21, %v196_v5 }
 0x16d   :  { %v205_v15 = vadd.f32 1.0, %v201_v13  ;;  %v257_v38 = vmul.f32 %v253_v25, %v197_v10 }
 0x16e   :  { %666 = vrcp.f32 %v204_v14  ;;  %v262_v45 = vmul.f32 1.442695, %v256_v31 }
 0x16f   :  { %668 = vrcp.f32 %v205_v15  ;;  %v264_v51 = vmul.f32 1.442695, %v257_v38 }
 0x170   :  { %670 = vpow2.f32 %v258_v29 }
 0x171   :  { %672 = vpow2.f32 %v260_v36 }
 0x172   :  { %674 = vpow2.f32 %v262_v45 }
 0x173   :  { %676 = vpow2.f32 %v264_v51  ;;  %v186_v51 = vmul.f32 0.5, %v867_v48  ;;  %v722_v48 = vmov 1  }
 0x174   :  { %v663_v18 = vpop.eup %662  ;;  %660 = vset.pattern.permute.xlu1 %v722_v48  ;;  %661 = vset.pattern.permute.xlu0 %v722_v48 }
 0x175   :  { %v665_v22 = vpop.eup %664  ;;  %v214_v23 = vmul.f32 1.0614054, %v663_v18 }
 0x176   :  { %v215_v26 = vmul.f32 1.0614054, %v665_v22 }
 0x177   :  { %v218_v27 = vadd.f32 -1.4531521, %v214_v23 }
 0x178   :  { %v667_v28 = vpop.eup %666  ;;  %v219_v30 = vadd.f32 -1.4531521, %v215_v26 }
 0x179   :  { %v669_v32 = vpop.eup %668  ;;  %v222_v34 = vmul.f32 %v663_v18, %v218_v27  ;;  %v216_v37 = vmul.f32 1.0614054, %v667_v28 }
 0x17a   :  { %v223_v39 = vmul.f32 %v665_v22, %v219_v30  ;;  %v217_v40 = vmul.f32 1.0614054, %v669_v32  ;;  %v671_v19 = vpop.eup %670 }
 0x17b   :  { %v226_v41 = vadd.f32 1.4214138, %v222_v34  ;;  %v220_v43 = vadd.f32 -1.4531521, %v216_v37  ;;  %v673_v24 = vpop.eup %672 }
 0x17c   :  { %v227_v44 = vadd.f32 1.4214138, %v223_v39  ;;  %v221_v46 = vadd.f32 -1.4531521, %v217_v40  ;;  %v675_v34 = vpop.eup %674 }
 0x17d   :  { %v230_v47 = vmul.f32 %v663_v18, %v226_v41  ;;  %v224_v49 = vmul.f32 %v667_v28, %v220_v43  ;;  %v677_v38 = vpop.eup %676 }
 0x17e   :  { %v231_v54 = vmul.f32 %v665_v22, %v227_v44  ;;  %v225_v55 = vmul.f32 %v669_v32, %v221_v46 }
 0x17f   :  { %v234_v57 = vadd.f32 -0.28449672, %v230_v47  ;;  %v228_v58 = vadd.f32 1.4214138, %v224_v49 }
 0x180   :  { %v235_v60 = vadd.f32 -0.28449672, %v231_v54  ;;  %v229_v62 = vadd.f32 1.4214138, %v225_v55 }
 0x181   :  { %v238_v3 = vmul.f32 %v663_v18, %v234_v57  ;;  %v232_v5 = vmul.f32 %v667_v28, %v228_v58  ;;  %v189_v57 = vmul.f32 0.5, %v881_v59 }
 0x182   :  { %v239_v9 = vmul.f32 %v665_v22, %v235_v60  ;;  %v233_v10 = vmul.f32 %v669_v32, %v229_v62 }
 0x183   :  { %v242_v12 = vadd.f32 0.2548296, %v238_v3  ;;  %v236_v13 = vadd.f32 -0.28449672, %v232_v5 }
 0x184   :  { %v243_v14 = vadd.f32 0.2548296, %v239_v9  ;;  %v237_v15 = vadd.f32 -0.28449672, %v233_v10 }
 0x185   :  { %v246_v16 = vmul.f32 %v663_v18, %v242_v12  ;;  %v240_v17 = vmul.f32 %v667_v28, %v236_v13 }
 0x186   :  { %v247_v21 = vmul.f32 %v665_v22, %v243_v14  ;;  %v241_v23 = vmul.f32 %v669_v32, %v237_v15 }
 0x187   :  { %v266_v25 = vmul.f32 %v671_v19, %v246_v16  ;;  %v244_v26 = vadd.f32 0.2548296, %v240_v17 }
 0x188   :  { %v267_v27 = vmul.f32 %v673_v24, %v247_v21  ;;  %v245_v29 = vadd.f32 0.2548296, %v241_v23 }
 0x189   :  { %v270_v30 = vsub.f32 1.0, %v266_v25  ;;  %v248_v31 = vmul.f32 %v667_v28, %v244_v26 }
 0x18a   :  { %v271_v36 = vsub.f32 1.0, %v267_v27  ;;  %v249_v37 = vmul.f32 %v669_v32, %v245_v29 }
 0x18b   :  { %v278_v39 = vsub.f32 0.0, %v270_v30  ;;  %v268_v40 = vmul.f32 %v675_v34, %v248_v31 }
 0x18c   :  { %v279_v18 = vsub.f32 0.0, %v271_v36  ;;  %v269_v41 = vmul.f32 %v677_v38, %v249_v37 }
 0x18d   :  { %v282_v43 = vsel %vm274_vm10, %v278_v39, %v270_v30  ;;  %v272_v22 = vsub.f32 1.0, %v268_v40 }
 0x18e   :  { %v283_v44 = vsel %vm275_vm11, %v279_v18, %v271_v36  ;;  %v273_v45 = vsub.f32 1.0, %v269_v41  ;;  %v286_v47 = vadd.f32 1.0, %v282_v43 }
 0x18f   :  { %v280_v46 = vsub.f32 0.0, %v272_v22  ;;  %v287_v49 = vadd.f32 1.0, %v283_v44 }
 0x190   :  { %v281_v28 = vsub.f32 0.0, %v273_v45  ;;  %v290_v60 = vmul.f32 %v286_v47, %v186_v51 }
 0x191   :  { %v284_v32 = vsel %vm276_vm12, %v280_v46, %v272_v22  ;;  %v291_v3 = vmul.f32 %v287_v49, %v187_v53 }
 0x192   :  { %v288_v54 = vadd.f32 1.0, %v284_v32  ;;  %v285_v55 = vsel %vm277_vm13, %v281_v28, %v273_v45 }
 0x193   :  { %v289_v58 = vadd.f32 1.0, %v285_v55 }
 0x194   :  { %v292_v62 = vmul.f32 %v288_v54, %v188_v52 }
 0x195   :  { %v293_v61 = vmul.f32 %v289_v58, %v189_v57 }
 0x196   :  { %v640_v5 = vpack.i.bf16 %v292_v62, %v290_v60  ;;  %v602_v9 = vpack.c.bf16 %v292_v62, %v290_v60 }
 0x197   :  { %v645_v10 = vpack.i.bf16 %v293_v61, %v291_v3  ;;  %v600_v12 = vpack.c.bf16 %v293_v61, %v291_v3 }
 0x198   :  { %641 = vrot.lane.b32.xlu1 %v640_v5, %s718_s23 }
 0x199   :  { %646 = vrot.lane.b32.xlu0 %v645_v10, %s718_s23 }
 0x19c   :  { %651 = vrot.lane.b32.xlu1 %v640_v5, %s719_s24 }
 0x19d   :  { %656 = vrot.lane.b32.xlu0 %v645_v10, %s719_s24 }
 0x1a0   :  { %329 = vperm.xlu1 %660, %v784_v7  }
 0x1a1   :  { %333 = vperm.xlu0 %661, %v789_v8  }
 0x20a   :  { %v642_v50 = vpop.permute.xlu1 %641 }
 0x20b   :  { %v644_v56 = vunpack.i.h.bf16 %v642_v50  ;;  %v643_v59 = vunpack.i.l.bf16 %v642_v50  ;;  %v647_v63 = vpop.permute.xlu0 %646 }
 0x20c   :  { %v649_v13 = vunpack.i.h.bf16 %v647_v63  ;;  %v648_v14 = vunpack.i.l.bf16 %v647_v63 }
 0x20e   :  { %v652_v15 = vpop.permute.xlu1 %651  ;;  %v302_v16 = vsel %vm60_vm0, %v643_v59, %v648_v14  ;;  %v303_v17 = vsel %vm60_vm0, %v644_v56, %v649_v13  ;;  %v304_v19 = vsel %vm60_vm0, %v648_v14, %v643_v59  ;;  %v305_v7 = vsel %vm60_vm0, %v649_v13, %v644_v56 }
 0x20f   :  { %v654_v8 = vunpack.i.h.bf16 %v652_v15  ;;  %v653_v21 = vunpack.i.l.bf16 %v652_v15  ;;  %v657_v23 = vpop.permute.xlu0 %656  ;;  %v594_v24 = vpack.c.bf16 %v303_v17, %v302_v16  ;;  %v597_v25 = vpack.c.bf16 %v305_v7, %v304_v19 }
 0x210   :  { %v659_v26 = vunpack.i.h.bf16 %v657_v23  ;;  %v658_v27 = vunpack.i.l.bf16 %v657_v23 }
 0x211   :  { %596 = vmatprep.subr.msk.bf16.mxu1 %vm579_vm3, %v594_v24 }
 0x212   :  { %v320_v29 = vsel %vm79_vm4, %v658_v27, %v653_v21  ;;  %v321_v30 = vsel %vm79_vm4, %v659_v26, %v654_v8  ;;  %599 = vmatpush1.bf16.msk.msra.mxu1 %vm816_vm5, %v597_v25  ;;  %v318_v31 = vsel %vm79_vm4, %v653_v21, %v658_v27  ;;  %v319_v34 = vsel %vm79_vm4, %v654_v8, %v659_v26 }
 0x213   :  { %601 = vmatprep.subr.bf16.mxu1 %v600_v12  ;;  %v604_v36 = vpack.c.bf16 %v321_v30, %v320_v29  ;;  %v607_v20 = vpack.c.bf16 %v319_v34, %v318_v31 }
 0x216   :  { %603 = vmatpush1.bf16.msra.mxu1 %v602_v9 }
 0x217   :  { %606 = vmatprep.subr.msk.bf16.mxu1 %vm589_vm7, %v604_v36 }
 0x21a   :  { %609 = vmatpush1.bf16.msk.msra.mxu1 %vm852_vm8, %v607_v20 }
 0x21d   :  { %574 = vmatmul.mubr.msk.f32.vlgmr.msra.gmra.mrb[0].mxu1 %vm102_vm9, %v326_v33 }
 0x21e   :  { %412 = vmatprep.mubr.f32.mxu1 %v720_v6 }
 0x21f   :  { %v330_v35 = vpop.permute.xlu1 %329 }
 0x220   :  { %v334_v40 = vpop.permute.xlu0 %333 }
 0x221   :  { %575 = vmatmul.mubr.msk.f32.gmra.mrb[2].mxu1 %vm102_vm9, %v327_v11 }
 0x2f0   :  { %v408_v37 = vpop.f32.mrb[0].mxu1 }
 0x2f1   :  { %v944_v38 = vadd.f32 %v408_v37, %v330_v35  ;;  %v410_v42 = vpop.f32.mrb[1].mxu1 }
 0x2f2   :  { %v946_v39 = vadd.f32 %v410_v42, %v330_v35 }
 0x2f3   :  { %v949_v18 = vmul.f32 0.70710677, %v944_v38 }
 0x2f4   :  { %v952_v41 = vmul.f32 0.70710677, %v946_v39  ;;  %v414_v6 = vpop.f32.mrb[2].mxu1 }
 0x2f5   :  { %v427_v43 = vand.u32 2147483647, %v949_v18  ;;  %v955_v22 = vadd.f32 %v414_v6, %v334_v40  ;;  %v416_v44 = vpop.f32.mrb[3].mxu1  ;;  %vm507_vm14 = vcmp.lt.f32.partialorder %v949_v18, 0.0 }
 0x2f6   :  { %v428_v45 = vand.u32 2147483647, %v952_v41  ;;  %v958_v46 = vadd.f32 %v416_v44, %v334_v40  ;;  %vm508_vm15 = vcmp.lt.f32.partialorder %v952_v41, 0.0 }
 0x2f7   :  { %v431_v47 = vmul.f32 0.3275911, %v427_v43  ;;  %v961_v28 = vmul.f32 0.70710677, %v955_v22  ;;  %v483_v62 = vsub.f32 0.0, %v427_v43 }
 0x2f8   :  { %v432_v49 = vmul.f32 0.3275911, %v428_v45  ;;  %v964_v32 = vmul.f32 0.70710677, %v958_v46  ;;  %v484_v3 = vsub.f32 0.0, %v428_v45 }
 0x2f9   :  { %v435_v51 = vadd.f32 1.0, %v431_v47  ;;  %v429_v52 = vand.u32 2147483647, %v961_v28  ;;  %v487_v5 = vmul.f32 %v483_v62, %v427_v43  ;;  %vm509_vm0 = vcmp.lt.f32.partialorder %v961_v28, 0.0 }
 0x2fa   :  { %v436_v54 = vadd.f32 1.0, %v432_v49  ;;  %v430_v55 = vand.u32 2147483647, %v964_v32  ;;  %v488_v48 = vmul.f32 %v484_v3, %v428_v45  ;;  %vm510_vm1 = vcmp.lt.f32.partialorder %v964_v32, 0.0 }
 0x2fb   :  { %678 = vrcp.f32 %v435_v51  ;;  %v433_v53 = vmul.f32 0.3275911, %v429_v52  ;;  %v485_v9 = vsub.f32 0.0, %v429_v52  ;;  %v491_v13 = vmul.f32 1.442695, %v487_v5 }
 0x2fc   :  { %680 = vrcp.f32 %v436_v54  ;;  %v434_v57 = vmul.f32 0.3275911, %v430_v55  ;;  %v486_v50 = vsub.f32 0.0, %v430_v55  ;;  %v493_v19 = vmul.f32 1.442695, %v488_v48 }
 0x2fd   :  { %v437_v58 = vadd.f32 1.0, %v433_v53  ;;  %v489_v15 = vmul.f32 %v485_v9, %v429_v52 }
 0x2fe   :  { %v438_v60 = vadd.f32 1.0, %v434_v57  ;;  %v490_v8 = vmul.f32 %v486_v50, %v430_v55 }
 0x2ff   :  { %682 = vrcp.f32 %v437_v58  ;;  %v495_v27 = vmul.f32 1.442695, %v489_v15 }
 0x300   :  { %684 = vrcp.f32 %v438_v60  ;;  %v497_v34 = vmul.f32 1.442695, %v490_v8 }
 0x301   :  { %686 = vpow2.f32 %v491_v13 }
 0x302   :  { %688 = vpow2.f32 %v493_v19 }
 0x303   :  { %690 = vpow2.f32 %v495_v27 }
 0x304   :  { %692 = vpow2.f32 %v497_v34 }
 0x305   :  { %v679_v61 = vpop.eup %678 }
 0x306   :  { %v681_v10 = vpop.eup %680  ;;  %v447_v12 = vmul.f32 1.0614054, %v679_v61 }
 0x307   :  { %v448_v56 = vmul.f32 1.0614054, %v681_v10 }
 0x308   :  { %v451_v59 = vadd.f32 -1.4531521, %v447_v12 }
 0x309   :  { %v683_v63 = vpop.eup %682  ;;  %v452_v14 = vadd.f32 -1.4531521, %v448_v56 }
 0x30a   :  { %v685_v16 = vpop.eup %684  ;;  %v455_v17 = vmul.f32 %v679_v61, %v451_v59  ;;  %v449_v7 = vmul.f32 1.0614054, %v683_v63 }
 0x30b   :  { %v456_v21 = vmul.f32 %v681_v10, %v452_v14  ;;  %v450_v23 = vmul.f32 1.0614054, %v685_v16  ;;  %v687_v54 = vpop.eup %686 }
 0x30c   :  { %v459_v24 = vadd.f32 1.4214138, %v455_v17  ;;  %v453_v25 = vadd.f32 -1.4531521, %v449_v7  ;;  %v689_v57 = vpop.eup %688  ;;  %v419_v17 = vmul.f32 0.5, %v944_v38 }
 0x30d   :  { %v460_v26 = vadd.f32 1.4214138, %v456_v21  ;;  %v454_v29 = vadd.f32 -1.4531521, %v450_v23  ;;  %v691_v12 = vpop.eup %690 }
 0x30e   :  { %v463_v30 = vmul.f32 %v679_v61, %v459_v24  ;;  %v457_v31 = vmul.f32 %v683_v63, %v453_v25  ;;  %v693_v56 = vpop.eup %692 }
 0x30f   :  { %v464_v36 = vmul.f32 %v681_v10, %v460_v26  ;;  %v458_v20 = vmul.f32 %v685_v16, %v454_v29  ;;  %v421_v26 = vmul.f32 0.5, %v955_v22 }
 0x310   :  { %v467_v33 = vadd.f32 -0.28449672, %v463_v30  ;;  %v461_v11 = vadd.f32 1.4214138, %v457_v31 }
 0x311   :  { %v468_v35 = vadd.f32 -0.28449672, %v464_v36  ;;  %v462_v37 = vadd.f32 1.4214138, %v458_v20 }
 0x312   :  { %v471_v42 = vmul.f32 %v679_v61, %v467_v33  ;;  %v465_v40 = vmul.f32 %v683_v63, %v461_v11 }
 0x313   :  { %v472_v6 = vmul.f32 %v681_v10, %v468_v35  ;;  %v466_v43 = vmul.f32 %v685_v16, %v462_v37 }
 0x314   :  { %v475_v44 = vadd.f32 0.2548296, %v471_v42  ;;  %v469_v45 = vadd.f32 -0.28449672, %v465_v40 }
 0x315   :  { %v476_v47 = vadd.f32 0.2548296, %v472_v6  ;;  %v470_v49 = vadd.f32 -0.28449672, %v466_v43 }
 0x316   :  { %v479_v51 = vmul.f32 %v679_v61, %v475_v44  ;;  %v473_v52 = vmul.f32 %v683_v63, %v469_v45 }
 0x317   :  { %v480_v55 = vmul.f32 %v681_v10, %v476_v47  ;;  %v474_v53 = vmul.f32 %v685_v16, %v470_v49 }
 0x318   :  { %v499_v58 = vmul.f32 %v687_v54, %v479_v51  ;;  %v477_v60 = vadd.f32 0.2548296, %v473_v52 }
 0x319   :  { %v500_v62 = vmul.f32 %v689_v57, %v480_v55  ;;  %v478_v3 = vadd.f32 0.2548296, %v474_v53 }
 0x31a   :  { %v503_v5 = vsub.f32 1.0, %v499_v58  ;;  %v481_v9 = vmul.f32 %v683_v63, %v477_v60  ;;  %v420_v63 = vmul.f32 0.5, %v946_v39  ;;  %v422_v39 = vmul.f32 0.5, %v958_v46 }
 0x31b   :  { %v504_v48 = vsub.f32 1.0, %v500_v62  ;;  %v482_v50 = vmul.f32 %v685_v16, %v478_v3 }
 0x31c   :  { %v511_v59 = vsub.f32 0.0, %v503_v5  ;;  %v501_v13 = vmul.f32 %v691_v12, %v481_v9 }
 0x31d   :  { %v512_v61 = vsub.f32 0.0, %v504_v48  ;;  %v502_v14 = vmul.f32 %v693_v56, %v482_v50 }
 0x31e   :  { %v515_v15 = vsel %vm507_vm14, %v511_v59, %v503_v5  ;;  %v505_v10 = vsub.f32 1.0, %v501_v13 }
 0x31f   :  { %v519_v19 = vadd.f32 1.0, %v515_v15  ;;  %v516_v7 = vsel %vm508_vm15, %v512_v61, %v504_v48  ;;  %v506_v8 = vsub.f32 1.0, %v502_v14 }
 0x320   :  { %v520_v21 = vadd.f32 1.0, %v516_v7  ;;  %v513_v16 = vsub.f32 0.0, %v505_v10 }
 0x321   :  { %v523_v23 = vmul.f32 %v519_v19, %v419_v17  ;;  %v514_v24 = vsub.f32 0.0, %v506_v8 }
 0x322   :  { %v524_v18 = vmul.f32 %v520_v21, %v420_v63  ;;  %v517_v25 = vsel %vm509_vm0, %v513_v16, %v505_v10 }
 0x323   :  { %v527_v41 = vadd.f32 %v523_v23, %v754_v0  ;;  %v521_v38 = vadd.f32 1.0, %v517_v25  ;;  %v518_v27 = vsel %vm510_vm1, %v514_v24, %v506_v8 }
 0x324   :  { %v533_v29 = vadd.f32 %v764_v2, %v524_v18  ;;  %v522_v30 = vadd.f32 1.0, %v518_v27 }
 0x325   :  { %529 = vst [vmem:[#allocation2] sm:$0xff] %v527_v41  ;;  %v525_v31 = vmul.f32 %v521_v38, %v421_v26 }
 0x326   :  { %536 = vst [vmem:[#allocation2 + $0x10] sm:$0xff] %v533_v29  ;;  %v526_v28 = vmul.f32 %v522_v30, %v422_v39 }
 0x327   :  { %v528_v34 = vadd.f32 %v525_v31, %v759_v1 }
 0x328   :  { %v534_v32 = vadd.f32 %v771_v4, %v526_v28 }
 0x329   :  { %530 = vst [vmem:[#allocation2 + $0x8] sm:$0xff] %v528_v34 }
 0x32a   :  { %537 = vst [vmem:[#allocation2 + $0x18] sm:$0xff] %v534_v32 }
 0x32b   :  { %705 = shalt.err (!%p702_p4)
}
 0x32c   :  { %s706_s12 = scalar_lea.hbm %s996_s4, 512 }
 0x32d   :  { %p707_p5 = scmp.ne.s32.totalorder %s996_s4, %s706_s12  ;;  %p710_p6 = scmp.lt.u32.totalorder %s706_s12, %s996_s4 }
 0x32f   :  { %p712_p7 = pnand %p710_p6, %p707_p5 }
 0x331   :  { %715 = shalt.err (!%p712_p7)
}
 0x332   :  { %s724_s17 = smov 128   ;;  %s725_s18 = smov 8  }
 0x333   :  { %549 = dma.vmem_to_hbm [thread:$0]  %s544_s8, 512, %s996_s4, [#allocation3], %s724_s17, %s724_s17, %s725_s18  }
 0x334   :  { %716 = dma.done.wait [#allocation3], 512  }
 0x335   :  { %717 = vsyncadd [#allocation3], 4294966784 }
 0x336   :  { %553 = vsyncpa [#allocation3], 1 }

</bundles_post_ra>
